<compile_context>
chip_gen: v6e
topology: v6e:2x2x1
jax: 0.10.0
libtpu: 0.0.40
codegen_flags: <defaults>
</compile_context>

<pallas_src>
import functools

import jax
import jax.numpy as jnp
from jax.experimental import pallas as pl
from jax.experimental.pallas import tpu as pltpu

LANE = 128
SUBLANE = 8

_VMEM_INPUT_BUDGET = 24 * 1024 * 1024   # target for double-buffered streamed input
_VMEM_LIMIT_CAP = 32 * 1024 * 1024      # safe on v7x (64 MiB phys) and v5e/v6e
_VMEM_LIMIT_FLOOR = 16 * 1024 * 1024


def _pick_tile_rows(m_rows, n_score_classes, score_itemsize, target_itemsize,
                    tile_m):
    """Largest legal sublane tile keeping double-buffered inputs + f32
    temporaries inside the VMEM budget (C- and dtype-aware clamp)."""
    row_in = LANE * (n_score_classes * score_itemsize + target_itemsize)
    row_tmp = LANE * 4 * 6          # ~6 f32 (tm,128) temporaries in the class loop
    tm_cap = max(32, _VMEM_INPUT_BUDGET // (2 * row_in + row_tmp))
    tm = min(tile_m, tm_cap)
    if m_rows <= tm:
        # Whole spatial extent fits in one block.  Prefer a multiple-of-8 tile
        # (full (8,128) slab accumulation) with a short masked tail otherwise.
        if m_rows % SUBLANE == 0 or m_rows < 32:
            return m_rows
        return (m_rows // 32) * 32
    # Multiple of 32 keeps the second-to-last block dim legal for f32/bf16/int8.
    return max(32, (tm // 32) * 32)


def _make_dice_sums_kernel(num_class, skip_class0_dma, tile_rows, num_tiles,
                           tiles_inner, rows_valid, has_ghost_step):
    """Per-(batch, spatial-outer, spatial-inner) partial-sum kernel."""
    cls_base = 1 if skip_class0_dma else 0
    needs_tail_mask = (rows_valid % tile_rows) != 0
    use_slab = (tile_rows % SUBLANE) == 0

    def kernel(score_ref, target_ref, inter_ref, psum_ref, ysum_ref):
        # score_ref : (1, C or 1, tile_rows, 128)  input dtype (f32 / bf16 / ...)
        # target_ref: (1, tile_rows, 128)          integer labels
        # outputs   : (1, 1, C-1, 8, 128) f32, resident across the inner axis.
        o = pl.program_id(1)
        i = pl.program_id(2)
        g = o * tiles_inner + i          # global spatial tile index

        @pl.when(i == 0)
        def _init():
            inter_ref[...] = jnp.zeros_like(inter_ref)
            psum_ref[...] = jnp.zeros_like(psum_ref)
            ysum_ref[...] = jnp.zeros_like(ysum_ref)

        def accumulate(mask_tail_rows):
            tgt = target_ref[0]                          # (tile_rows, 128)
            if mask_tail_rows:
                row = jax.lax.broadcasted_iota(jnp.int32, (tile_rows, LANE), 0)
                valid = (g * tile_rows + row) < rows_valid
                tgt = jnp.where(valid, tgt, -1)          # mask labels once
            # Short unrolled loop over foreground classes (no (C-1, tm, 128)
            # one-hot temporaries; vreg pressure independent of C).
            for c in range(1, num_class):
                pre = score_ref[0, c - cls_base].astype(jnp.float32)
                if mask_tail_rows:
                    pre = jnp.where(valid, pre, 0.0)
                y = (tgt == c).astype(jnp.float32)
                prod = pre * y
                sq = pre * pre
                if use_slab:
                    # Full-vreg (8,128) accumulator slabs: unmasked stores, no
                    # intra-vreg XLU sublane reduce on the hot path.
                    shp = (tile_rows // SUBLANE, SUBLANE, LANE)
                    inter_ref[0, 0, c - 1] += jnp.sum(prod.reshape(shp), axis=0)
                    psum_ref[0, 0, c - 1] += jnp.sum(sq.reshape(shp), axis=0)
                    ysum_ref[0, 0, c - 1] += jnp.sum(y.reshape(shp), axis=0)
                else:
                    # Tiny-tile fallback (tile_rows not a multiple of 8).
                    inter_ref[0, 0, c - 1, 0:1, :] += jnp.sum(
                        prod, axis=0, keepdims=True)
                    psum_ref[0, 0, c - 1, 0:1, :] += jnp.sum(
                        sq, axis=0, keepdims=True)
                    ysum_ref[0, 0, c - 1, 0:1, :] += jnp.sum(
                        y, axis=0, keepdims=True)

        if needs_tail_mask:
            # Masking off the hot path: only the last real tile pays it.
            @pl.when(g < num_tiles - 1)
            def _hot():
                accumulate(False)

            @pl.when(g == num_tiles - 1)
            def _tail():
                accumulate(True)
        elif has_ghost_step:
            @pl.when(g < num_tiles)
            def _hot():
                accumulate(False)
        else:
            accumulate(False)

    return kernel


@functools.partial(jax.jit, static_argnames=("num_class", "epsilon", "tile_m"))
def square_dice_loss(score, target, *, num_class, epsilon=1e-5, tile_m=2048):
    """Forward pass of SquareDiceLoss for NCDHW `score` and NDHW `target`."""
    if num_class <= 1:
        return jnp.float32(0.0)          # degenerate: loss = num_class - 1 - 0

    B, C = score.shape[0], score.shape[1]
    assert C == num_class, "score channel dim must equal num_class"
    cm1 = num_class - 1
    S = 1
    for d in score.shape[2:]:
        S *= d

    # Dtype hygiene: stream the narrow input dtypes (bf16 score / int8 target
    # pass through untouched) and upcast per-tile inside the kernel.
    if not jnp.issubdtype(score.dtype, jnp.floating):
        score = score.astype(jnp.float32)
    if jnp.issubdtype(target.dtype, jnp.bool_) or jnp.issubdtype(
            target.dtype, jnp.unsignedinteger):
        target = target.astype(jnp.int32)

    score_f = score.reshape(B, C, S)
    target_f = target.reshape(B, S)

    if S % LANE != 0:
        # TODO(synk): this pad is one extra read+write HBM pass over score; a
        # zero-copy tail path would need manual DMA over the flat layout.
        pad = LANE - S % LANE
        score_f = jnp.pad(score_f, ((0, 0), (0, 0), (0, pad)))
        target_f = jnp.pad(target_f, ((0, 0), (0, pad)), constant_values=-1)
        S += pad

    M = S // LANE
    score_f = score_f.reshape(B, C, M, LANE)
    target_f = target_f.reshape(B, M, LANE)

    # Binary dice: never DMA the (unused) class-0 plane (50% of score traffic).
    skip_class0 = num_class == 2
    score_blk_c = 1 if skip_class0 else C
    score_c_base = 1 if skip_class0 else 0

    tm = _pick_tile_rows(M, score_blk_c, score_f.dtype.itemsize,
                         target_f.dtype.itemsize, tile_m)
    T = pl.cdiv(M, tm)

    # Megacore: if the batch axis alone can't feed both TensorCores (B odd,
    # incl. B==1), also shard the spatial axis (outer "parallel" slots).
    n_outer = 2 if (B % 2 == 1 and T >= 2) else 1
    t_inner = pl.cdiv(T, n_outer)
    has_ghost = n_outer * t_inner != T     # one padded, compute-skipped step

    def spatial_idx(o, i):
        g = o * t_inner + i
        return jnp.minimum(g, T - 1) if has_ghost else g

    kernel = _make_dice_sums_kernel(num_class, skip_class0, tm, T, t_inner, M,
                                    has_ghost)

    # Derived VMEM budget: double-buffered inputs + f32 temporaries + outputs.
    in_bytes = 2 * tm * LANE * (score_blk_c * score_f.dtype.itemsize
                                + target_f.dtype.itemsize)
    tmp_bytes = 6 * tm * LANE * 4
    out_bytes = 2 * 3 * cm1 * SUBLANE * LANE * 4
    vmem_limit = int(min(_VMEM_LIMIT_CAP,
                         max(_VMEM_LIMIT_FLOOR,
                             in_bytes + tmp_bytes + out_bytes + 2 * 1024 * 1024)))

    out_sd = jax.ShapeDtypeStruct((B, n_outer, cm1, SUBLANE, LANE), jnp.float32)

    inter, psum, ysum = pl.pallas_call(
        kernel,
        out_shape=[out_sd] * 3,
        grid_spec=pltpu.PrefetchScalarGridSpec(
            num_scalar_prefetch=0,
            grid=(B, n_outer, t_inner),
            in_specs=[
                pl.BlockSpec((1, score_blk_c, tm, LANE),
                             lambda b, o, i: (b, score_c_base,
                                              spatial_idx(o, i), 0)),
                pl.BlockSpec((1, tm, LANE),
                             lambda b, o, i: (b, spatial_idx(o, i), 0)),
            ],
            out_specs=[pl.BlockSpec((1, 1, cm1, SUBLANE, LANE),
                                    lambda b, o, i: (b, o, 0, 0, 0))] * 3,
        ),
        compiler_params=pltpu.CompilerParams(
            dimension_semantics=("parallel", "parallel", "arbitrary"),
            vmem_limit_bytes=vmem_limit,
        ),
    )(score_f, target_f)

    # Tiny final reductions (batch/outer partials, 8 sublanes, 128 lanes) + dice.
    inter_c = jnp.sum(inter, axis=(0, 1, 3, 4))
    psum_c = jnp.sum(psum, axis=(0, 1, 3, 4))
    ysum_c = jnp.sum(ysum, axis=(0, 1, 3, 4))
    dice = 2.0 * (inter_c + epsilon) / (psum_c + ysum_c + epsilon)
    return jnp.float32(num_class - 1) - jnp.sum(dice)


def _reference(score, target, num_class, epsilon=1e-5):
    loss = 0.0
    for c in range(1, num_class):
        pre = score[:, c]
        y = (target == c).astype(jnp.float32)
        intersect = jnp.sum(pre * y)
        pre_sum = jnp.sum(pre * pre)
        y_sum = jnp.sum(y * y)
        loss += 2.0 * (intersect + epsilon) / (pre_sum + y_sum + epsilon)
    return num_class - 1 - loss


if __name__ == "__main__":
    key = jax.random.PRNGKey(0)
    k1, k2, k3, k4, k5, k6 = jax.random.split(key, 6)

    # Case 1: canonical shapes (B=2, C=4, 8x16x16), f32.
    nc1 = 4
    s1 = jax.random.normal(k1, (2, nc1, 8, 16, 16), dtype=jnp.float32)
    t1 = jax.random.randint(k2, (2, 8, 16, 16), 0, nc1, dtype=jnp.int32)
    out1 = jax.block_until_ready(square_dice_loss(s1, t1, num_class=nc1))
    ref1 = _reference(s1, t1, nc1)
    assert jnp.allclose(out1, ref1, rtol=1e-5, atol=1e-5), (out1, ref1)

    # Case 2: B=1 (odd -> spatial axis split across cores), partial tail tile
    # and a skipped "ghost" grid step (T=3 split as 2x2).
    nc2 = 3
    s2 = jax.random.normal(k3, (1, nc2, 5, 16, 128), dtype=jnp.float32)
    t2 = jax.random.randint(k4, (1, 5, 16, 128), 0, nc2, dtype=jnp.int32)
    out2 = jax.block_until_ready(square_dice_loss(s2, t2, num_class=nc2,
                                                  tile_m=32))
    ref2 = _reference(s2, t2, nc2)
    assert jnp.allclose(out2, ref2, rtol=1e-5, atol=1e-5), (out2, ref2)

    # Case 3: binary dice (class-0 plane never DMA'd), bf16 score, lane-pad path.
    nc3 = 2
    s3 = jax.random.normal(k5, (2, nc3, 3, 5, 7), dtype=jnp.bfloat16)
    t3 = jax.random.randint(k6, (2, 3, 5, 7), 0, nc3, dtype=jnp.int32)
    out3 = jax.block_until_ready(square_dice_loss(s3, t3, num_class=nc3))
    ref3 = _reference(s3.astype(jnp.float32), t3, nc3)
    assert jnp.allclose(out3, ref3, rtol=1e-4, atol=1e-4), (out3, ref3)

    print("KERNEL_OK")
</pallas_src>

<mosaic_0001>
module attributes {stable_mosaic.version = 11 : i64} {
  func.func @kernel(%arg0: i32, %arg1: i32, %arg2: i32, %arg3: memref<1x4x16x128xf32, #tpu.memory_space<vmem>>, %arg4: memref<1x16x128xi32, #tpu.memory_space<vmem>>, %arg5: memref<1x1x3x8x128xf32, #tpu.memory_space<vmem>>, %arg6: memref<1x1x3x8x128xf32, #tpu.memory_space<vmem>>, %arg7: memref<1x1x3x8x128xf32, #tpu.memory_space<vmem>>) attributes {dimension_semantics = [#tpu.dimension_semantics<parallel>, #tpu.dimension_semantics<parallel>, #tpu.dimension_semantics<arbitrary>], iteration_bounds = array<i64: 2, 1, 1>, scalar_prefetch = 0 : i64, scratch_operands = 0 : i64, tpu.core_type = #tpu.core_type<tc>, window_params = [{transform_indices = @transform_0, window_bounds = array<i64: 1, 4, 16, 128>}, {transform_indices = @transform_1, window_bounds = array<i64: 1, 16, 128>}, {transform_indices = @transform_2, window_bounds = array<i64: 1, 1, 3, 8, 128>}, {transform_indices = @transform_3, window_bounds = array<i64: 1, 1, 3, 8, 128>}, {transform_indices = @transform_4, window_bounds = array<i64: 1, 1, 3, 8, 128>}]} {
    %c0_i32 = arith.constant 0 : i32
    %0 = arith.cmpi eq, %arg2, %c0_i32 : i32
    %1 = arith.extui %0 : i1 to i32
    %c0_i32_0 = arith.constant 0 : i32
    %2 = arith.cmpi ne, %1, %c0_i32_0 : i32
    scf.if %2 {
      %cst_110 = arith.constant 0.000000e+00 : f32
      %101 = vector.broadcast %cst_110 : f32 to vector<1x1x3x8x128xf32>
      %c0_111 = arith.constant 0 : index
      %c0_112 = arith.constant 0 : index
      %c0_113 = arith.constant 0 : index
      %c0_114 = arith.constant 0 : index
      %c0_115 = arith.constant 0 : index
      %102 = vector.load %arg5[%c0_111, %c0_112, %c0_113, %c0_114, %c0_115] : memref<1x1x3x8x128xf32, #tpu.memory_space<vmem>>, vector<1x1x3x8x128xf32>
      tpu.vector_store %arg5[%c0_111, %c0_112, %c0_113, %c0_114, %c0_115], %101 {strides = array<i32>} : memref<1x1x3x8x128xf32, #tpu.memory_space<vmem>>, vector<1x1x3x8x128xf32>,
      %cst_116 = arith.constant 0.000000e+00 : f32
      %103 = vector.broadcast %cst_116 : f32 to vector<1x1x3x8x128xf32>
      %c0_117 = arith.constant 0 : index
      %c0_118 = arith.constant 0 : index
      %c0_119 = arith.constant 0 : index
      %c0_120 = arith.constant 0 : index
      %c0_121 = arith.constant 0 : index
      %104 = vector.load %arg6[%c0_117, %c0_118, %c0_119, %c0_120, %c0_121] : memref<1x1x3x8x128xf32, #tpu.memory_space<vmem>>, vector<1x1x3x8x128xf32>
      tpu.vector_store %arg6[%c0_117, %c0_118, %c0_119, %c0_120, %c0_121], %103 {strides = array<i32>} : memref<1x1x3x8x128xf32, #tpu.memory_space<vmem>>, vector<1x1x3x8x128xf32>,
      %cst_122 = arith.constant 0.000000e+00 : f32
      %105 = vector.broadcast %cst_122 : f32 to vector<1x1x3x8x128xf32>
      %c0_123 = arith.constant 0 : index
      %c0_124 = arith.constant 0 : index
      %c0_125 = arith.constant 0 : index
      %c0_126 = arith.constant 0 : index
      %c0_127 = arith.constant 0 : index
      %106 = vector.load %arg7[%c0_123, %c0_124, %c0_125, %c0_126, %c0_127] : memref<1x1x3x8x128xf32, #tpu.memory_space<vmem>>, vector<1x1x3x8x128xf32>
      tpu.vector_store %arg7[%c0_123, %c0_124, %c0_125, %c0_126, %c0_127], %105 {strides = array<i32>} : memref<1x1x3x8x128xf32, #tpu.memory_space<vmem>>, vector<1x1x3x8x128xf32>,
    } else {
    }
    %c0 = arith.constant 0 : index
    %c0_1 = arith.constant 0 : index
    %c0_2 = arith.constant 0 : index
    %3 = vector.load %arg4[%c0, %c0_1, %c0_2] : memref<1x16x128xi32, #tpu.memory_space<vmem>>, vector<1x16x128xi32>
    %4 = vector.shape_cast %3 : vector<1x16x128xi32> to vector<16x128xi32>
    %c0_3 = arith.constant 0 : index
    %c1 = arith.constant 1 : index
    %c0_4 = arith.constant 0 : index
    %c0_5 = arith.constant 0 : index
    %5 = vector.load %arg3[%c0_3, %c1, %c0_4, %c0_5] : memref<1x4x16x128xf32, #tpu.memory_space<vmem>>, vector<1x1x16x128xf32>
    %6 = vector.shape_cast %5 : vector<1x1x16x128xf32> to vector<16x128xf32>
    %c1_i32 = arith.constant 1 : i32
    %7 = vector.broadcast %c1_i32 : i32 to vector<16x128xi32>
    %8 = arith.cmpi eq, %4, %7 : vector<16x128xi32>
    %9 = arith.extui %8 : vector<16x128xi1> to vector<16x128xi32>
    %10 = arith.sitofp %9 : vector<16x128xi32> to vector<16x128xf32>
    %11 = arith.mulf %6, %10 : vector<16x128xf32>
    %12 = arith.mulf %6, %6 : vector<16x128xf32>
    %c0_6 = arith.constant 0 : index
    %c0_7 = arith.constant 0 : index
    %c0_8 = arith.constant 0 : index
    %c0_9 = arith.constant 0 : index
    %c0_10 = arith.constant 0 : index
    %13 = vector.load %arg5[%c0_6, %c0_7, %c0_8, %c0_9, %c0_10] : memref<1x1x3x8x128xf32, #tpu.memory_space<vmem>>, vector<1x1x1x8x128xf32>
    %14 = vector.shape_cast %13 : vector<1x1x1x8x128xf32> to vector<8x128xf32>
    %15 = vector.shape_cast %11 : vector<16x128xf32> to vector<2x8x128xf32>
    %cst = arith.constant dense<0.000000e+00> : vector<8x128xf32>
    %16 = vector.multi_reduction <add>, %15, %cst [0] : vector<2x8x128xf32> to vector<8x128xf32>
    %17 = arith.addf %14, %16 : vector<8x128xf32>
    %c0_11 = arith.constant 0 : index
    %c0_12 = arith.constant 0 : index
    %c0_13 = arith.constant 0 : index
    %c0_14 = arith.constant 0 : index
    %c0_15 = arith.constant 0 : index
    %18 = vector.load %arg5[%c0_11, %c0_12, %c0_13, %c0_14, %c0_15] : memref<1x1x3x8x128xf32, #tpu.memory_space<vmem>>, vector<1x1x1x8x128xf32>
    %19 = vector.shape_cast %18 : vector<1x1x1x8x128xf32> to vector<8x128xf32>
    %20 = vector.shape_cast %17 : vector<8x128xf32> to vector<1x1x1x8x128xf32>
    tpu.vector_store %arg5[%c0_11, %c0_12, %c0_13, %c0_14, %c0_15], %20 {strides = array<i32>} : memref<1x1x3x8x128xf32, #tpu.memory_space<vmem>>, vector<1x1x1x8x128xf32>,
    %c0_16 = arith.constant 0 : index
    %c0_17 = arith.constant 0 : index
    %c0_18 = arith.constant 0 : index
    %c0_19 = arith.constant 0 : index
    %c0_20 = arith.constant 0 : index
    %21 = vector.load %arg6[%c0_16, %c0_17, %c0_18, %c0_19, %c0_20] : memref<1x1x3x8x128xf32, #tpu.memory_space<vmem>>, vector<1x1x1x8x128xf32>
    %22 = vector.shape_cast %21 : vector<1x1x1x8x128xf32> to vector<8x128xf32>
    %23 = vector.shape_cast %12 : vector<16x128xf32> to vector<2x8x128xf32>
    %cst_21 = arith.constant dense<0.000000e+00> : vector<8x128xf32>
    %24 = vector.multi_reduction <add>, %23, %cst_21 [0] : vector<2x8x128xf32> to vector<8x128xf32>
    %25 = arith.addf %22, %24 : vector<8x128xf32>
    %c0_22 = arith.constant 0 : index
    %c0_23 = arith.constant 0 : index
    %c0_24 = arith.constant 0 : index
    %c0_25 = arith.constant 0 : index
    %c0_26 = arith.constant 0 : index
    %26 = vector.load %arg6[%c0_22, %c0_23, %c0_24, %c0_25, %c0_26] : memref<1x1x3x8x128xf32, #tpu.memory_space<vmem>>, vector<1x1x1x8x128xf32>
    %27 = vector.shape_cast %26 : vector<1x1x1x8x128xf32> to vector<8x128xf32>
    %28 = vector.shape_cast %25 : vector<8x128xf32> to vector<1x1x1x8x128xf32>
    tpu.vector_store %arg6[%c0_22, %c0_23, %c0_24, %c0_25, %c0_26], %28 {strides = array<i32>} : memref<1x1x3x8x128xf32, #tpu.memory_space<vmem>>, vector<1x1x1x8x128xf32>,
    %c0_27 = arith.constant 0 : index
    %c0_28 = arith.constant 0 : index
    %c0_29 = arith.constant 0 : index
    %c0_30 = arith.constant 0 : index
    %c0_31 = arith.constant 0 : index
    %29 = vector.load %arg7[%c0_27, %c0_28, %c0_29, %c0_30, %c0_31] : memref<1x1x3x8x128xf32, #tpu.memory_space<vmem>>, vector<1x1x1x8x128xf32>
    %30 = vector.shape_cast %29 : vector<1x1x1x8x128xf32> to vector<8x128xf32>
    %31 = vector.shape_cast %10 : vector<16x128xf32> to vector<2x8x128xf32>
    %cst_32 = arith.constant dense<0.000000e+00> : vector<8x128xf32>
    %32 = vector.multi_reduction <add>, %31, %cst_32 [0] : vector<2x8x128xf32> to vector<8x128xf32>
    %33 = arith.addf %30, %32 : vector<8x128xf32>
    %c0_33 = arith.constant 0 : index
    %c0_34 = arith.constant 0 : index
    %c0_35 = arith.constant 0 : index
    %c0_36 = arith.constant 0 : index
    %c0_37 = arith.constant 0 : index
    %34 = vector.load %arg7[%c0_33, %c0_34, %c0_35, %c0_36, %c0_37] : memref<1x1x3x8x128xf32, #tpu.memory_space<vmem>>, vector<1x1x1x8x128xf32>
    %35 = vector.shape_cast %34 : vector<1x1x1x8x128xf32> to vector<8x128xf32>
    %36 = vector.shape_cast %33 : vector<8x128xf32> to vector<1x1x1x8x128xf32>
    tpu.vector_store %arg7[%c0_33, %c0_34, %c0_35, %c0_36, %c0_37], %36 {strides = array<i32>} : memref<1x1x3x8x128xf32, #tpu.memory_space<vmem>>, vector<1x1x1x8x128xf32>,
    %c0_38 = arith.constant 0 : index
    %c2 = arith.constant 2 : index
    %c0_39 = arith.constant 0 : index
    %c0_40 = arith.constant 0 : index
    %37 = vector.load %arg3[%c0_38, %c2, %c0_39, %c0_40] : memref<1x4x16x128xf32, #tpu.memory_space<vmem>>, vector<1x1x16x128xf32>
    %38 = vector.shape_cast %37 : vector<1x1x16x128xf32> to vector<16x128xf32>
    %c2_i32 = arith.constant 2 : i32
    %39 = vector.broadcast %c2_i32 : i32 to vector<16x128xi32>
    %40 = arith.cmpi eq, %4, %39 : vector<16x128xi32>
    %41 = arith.extui %40 : vector<16x128xi1> to vector<16x128xi32>
    %42 = arith.sitofp %41 : vector<16x128xi32> to vector<16x128xf32>
    %43 = arith.mulf %38, %42 : vector<16x128xf32>
    %44 = arith.mulf %38, %38 : vector<16x128xf32>
    %c0_41 = arith.constant 0 : index
    %c0_42 = arith.constant 0 : index
    %c1_43 = arith.constant 1 : index
    %c0_44 = arith.constant 0 : index
    %c0_45 = arith.constant 0 : index
    %45 = vector.load %arg5[%c0_41, %c0_42, %c1_43, %c0_44, %c0_45] : memref<1x1x3x8x128xf32, #tpu.memory_space<vmem>>, vector<1x1x1x8x128xf32>
    %46 = vector.shape_cast %45 : vector<1x1x1x8x128xf32> to vector<8x128xf32>
    %47 = vector.shape_cast %43 : vector<16x128xf32> to vector<2x8x128xf32>
    %cst_46 = arith.constant dense<0.000000e+00> : vector<8x128xf32>
    %48 = vector.multi_reduction <add>, %47, %cst_46 [0] : vector<2x8x128xf32> to vector<8x128xf32>
    %49 = arith.addf %46, %48 : vector<8x128xf32>
    %c0_47 = arith.constant 0 : index
    %c0_48 = arith.constant 0 : index
    %c1_49 = arith.constant 1 : index
    %c0_50 = arith.constant 0 : index
    %c0_51 = arith.constant 0 : index
    %50 = vector.load %arg5[%c0_47, %c0_48, %c1_49, %c0_50, %c0_51] : memref<1x1x3x8x128xf32, #tpu.memory_space<vmem>>, vector<1x1x1x8x128xf32>
    %51 = vector.shape_cast %50 : vector<1x1x1x8x128xf32> to vector<8x128xf32>
    %52 = vector.shape_cast %49 : vector<8x128xf32> to vector<1x1x1x8x128xf32>
    tpu.vector_store %arg5[%c0_47, %c0_48, %c1_49, %c0_50, %c0_51], %52 {strides = array<i32>} : memref<1x1x3x8x128xf32, #tpu.memory_space<vmem>>, vector<1x1x1x8x128xf32>,
    %c0_52 = arith.constant 0 : index
    %c0_53 = arith.constant 0 : index
    %c1_54 = arith.constant 1 : index
    %c0_55 = arith.constant 0 : index
    %c0_56 = arith.constant 0 : index
    %53 = vector.load %arg6[%c0_52, %c0_53, %c1_54, %c0_55, %c0_56] : memref<1x1x3x8x128xf32, #tpu.memory_space<vmem>>, vector<1x1x1x8x128xf32>
    %54 = vector.shape_cast %53 : vector<1x1x1x8x128xf32> to vector<8x128xf32>
    %55 = vector.shape_cast %44 : vector<16x128xf32> to vector<2x8x128xf32>
    %cst_57 = arith.constant dense<0.000000e+00> : vector<8x128xf32>
    %56 = vector.multi_reduction <add>, %55, %cst_57 [0] : vector<2x8x128xf32> to vector<8x128xf32>
    %57 = arith.addf %54, %56 : vector<8x128xf32>
    %c0_58 = arith.constant 0 : index
    %c0_59 = arith.constant 0 : index
    %c1_60 = arith.constant 1 : index
    %c0_61 = arith.constant 0 : index
    %c0_62 = arith.constant 0 : index
    %58 = vector.load %arg6[%c0_58, %c0_59, %c1_60, %c0_61, %c0_62] : memref<1x1x3x8x128xf32, #tpu.memory_space<vmem>>, vector<1x1x1x8x128xf32>
    %59 = vector.shape_cast %58 : vector<1x1x1x8x128xf32> to vector<8x128xf32>
    %60 = vector.shape_cast %57 : vector<8x128xf32> to vector<1x1x1x8x128xf32>
    tpu.vector_store %arg6[%c0_58, %c0_59, %c1_60, %c0_61, %c0_62], %60 {strides = array<i32>} : memref<1x1x3x8x128xf32, #tpu.memory_space<vmem>>, vector<1x1x1x8x128xf32>,
    %c0_63 = arith.constant 0 : index
    %c0_64 = arith.constant 0 : index
    %c1_65 = arith.constant 1 : index
    %c0_66 = arith.constant 0 : index
    %c0_67 = arith.constant 0 : index
    %61 = vector.load %arg7[%c0_63, %c0_64, %c1_65, %c0_66, %c0_67] : memref<1x1x3x8x128xf32, #tpu.memory_space<vmem>>, vector<1x1x1x8x128xf32>
    %62 = vector.shape_cast %61 : vector<1x1x1x8x128xf32> to vector<8x128xf32>
    %63 = vector.shape_cast %42 : vector<16x128xf32> to vector<2x8x128xf32>
    %cst_68 = arith.constant dense<0.000000e+00> : vector<8x128xf32>
    %64 = vector.multi_reduction <add>, %63, %cst_68 [0] : vector<2x8x128xf32> to vector<8x128xf32>
    %65 = arith.addf %62, %64 : vector<8x128xf32>
    %c0_69 = arith.constant 0 : index
    %c0_70 = arith.constant 0 : index
    %c1_71 = arith.constant 1 : index
    %c0_72 = arith.constant 0 : index
    %c0_73 = arith.constant 0 : index
    %66 = vector.load %arg7[%c0_69, %c0_70, %c1_71, %c0_72, %c0_73] : memref<1x1x3x8x128xf32, #tpu.memory_space<vmem>>, vector<1x1x1x8x128xf32>
    %67 = vector.shape_cast %66 : vector<1x1x1x8x128xf32> to vector<8x128xf32>
    %68 = vector.shape_cast %65 : vector<8x128xf32> to vector<1x1x1x8x128xf32>
    tpu.vector_store %arg7[%c0_69, %c0_70, %c1_71, %c0_72, %c0_73], %68 {strides = array<i32>} : memref<1x1x3x8x128xf32, #tpu.memory_space<vmem>>, vector<1x1x1x8x128xf32>,
    %c0_74 = arith.constant 0 : index
    %c3 = arith.constant 3 : index
    %c0_75 = arith.constant 0 : index
    %c0_76 = arith.constant 0 : index
    %69 = vector.load %arg3[%c0_74, %c3, %c0_75, %c0_76] : memref<1x4x16x128xf32, #tpu.memory_space<vmem>>, vector<1x1x16x128xf32>
    %70 = vector.shape_cast %69 : vector<1x1x16x128xf32> to vector<16x128xf32>
    %c3_i32 = arith.constant 3 : i32
    %71 = vector.broadcast %c3_i32 : i32 to vector<16x128xi32>
    %72 = arith.cmpi eq, %4, %71 : vector<16x128xi32>
    %73 = arith.extui %72 : vector<16x128xi1> to vector<16x128xi32>
    %74 = arith.sitofp %73 : vector<16x128xi32> to vector<16x128xf32>
    %75 = arith.mulf %70, %74 : vector<16x128xf32>
    %76 = arith.mulf %70, %70 : vector<16x128xf32>
    %c0_77 = arith.constant 0 : index
    %c0_78 = arith.constant 0 : index
    %c2_79 = arith.constant 2 : index
    %c0_80 = arith.constant 0 : index
    %c0_81 = arith.constant 0 : index
    %77 = vector.load %arg5[%c0_77, %c0_78, %c2_79, %c0_80, %c0_81] : memref<1x1x3x8x128xf32, #tpu.memory_space<vmem>>, vector<1x1x1x8x128xf32>
    %78 = vector.shape_cast %77 : vector<1x1x1x8x128xf32> to vector<8x128xf32>
    %79 = vector.shape_cast %75 : vector<16x128xf32> to vector<2x8x128xf32>
    %cst_82 = arith.constant dense<0.000000e+00> : vector<8x128xf32>
    %80 = vector.multi_reduction <add>, %79, %cst_82 [0] : vector<2x8x128xf32> to vector<8x128xf32>
    %81 = arith.addf %78, %80 : vector<8x128xf32>
    %c0_83 = arith.constant 0 : index
    %c0_84 = arith.constant 0 : index
    %c2_85 = arith.constant 2 : index
    %c0_86 = arith.constant 0 : index
    %c0_87 = arith.constant 0 : index
    %82 = vector.load %arg5[%c0_83, %c0_84, %c2_85, %c0_86, %c0_87] : memref<1x1x3x8x128xf32, #tpu.memory_space<vmem>>, vector<1x1x1x8x128xf32>
    %83 = vector.shape_cast %82 : vector<1x1x1x8x128xf32> to vector<8x128xf32>
    %84 = vector.shape_cast %81 : vector<8x128xf32> to vector<1x1x1x8x128xf32>
    tpu.vector_store %arg5[%c0_83, %c0_84, %c2_85, %c0_86, %c0_87], %84 {strides = array<i32>} : memref<1x1x3x8x128xf32, #tpu.memory_space<vmem>>, vector<1x1x1x8x128xf32>,
    %c0_88 = arith.constant 0 : index
    %c0_89 = arith.constant 0 : index
    %c2_90 = arith.constant 2 : index
    %c0_91 = arith.constant 0 : index
    %c0_92 = arith.constant 0 : index
    %85 = vector.load %arg6[%c0_88, %c0_89, %c2_90, %c0_91, %c0_92] : memref<1x1x3x8x128xf32, #tpu.memory_space<vmem>>, vector<1x1x1x8x128xf32>
    %86 = vector.shape_cast %85 : vector<1x1x1x8x128xf32> to vector<8x128xf32>
    %87 = vector.shape_cast %76 : vector<16x128xf32> to vector<2x8x128xf32>
    %cst_93 = arith.constant dense<0.000000e+00> : vector<8x128xf32>
    %88 = vector.multi_reduction <add>, %87, %cst_93 [0] : vector<2x8x128xf32> to vector<8x128xf32>
    %89 = arith.addf %86, %88 : vector<8x128xf32>
    %c0_94 = arith.constant 0 : index
    %c0_95 = arith.constant 0 : index
    %c2_96 = arith.constant 2 : index
    %c0_97 = arith.constant 0 : index
    %c0_98 = arith.constant 0 : index
    %90 = vector.load %arg6[%c0_94, %c0_95, %c2_96, %c0_97, %c0_98] : memref<1x1x3x8x128xf32, #tpu.memory_space<vmem>>, vector<1x1x1x8x128xf32>
    %91 = vector.shape_cast %90 : vector<1x1x1x8x128xf32> to vector<8x128xf32>
    %92 = vector.shape_cast %89 : vector<8x128xf32> to vector<1x1x1x8x128xf32>
    tpu.vector_store %arg6[%c0_94, %c0_95, %c2_96, %c0_97, %c0_98], %92 {strides = array<i32>} : memref<1x1x3x8x128xf32, #tpu.memory_space<vmem>>, vector<1x1x1x8x128xf32>,
    %c0_99 = arith.constant 0 : index
    %c0_100 = arith.constant 0 : index
    %c2_101 = arith.constant 2 : index
    %c0_102 = arith.constant 0 : index
    %c0_103 = arith.constant 0 : index
    %93 = vector.load %arg7[%c0_99, %c0_100, %c2_101, %c0_102, %c0_103] : memref<1x1x3x8x128xf32, #tpu.memory_space<vmem>>, vector<1x1x1x8x128xf32>
    %94 = vector.shape_cast %93 : vector<1x1x1x8x128xf32> to vector<8x128xf32>
    %95 = vector.shape_cast %74 : vector<16x128xf32> to vector<2x8x128xf32>
    %cst_104 = arith.constant dense<0.000000e+00> : vector<8x128xf32>
    %96 = vector.multi_reduction <add>, %95, %cst_104 [0] : vector<2x8x128xf32> to vector<8x128xf32>
    %97 = arith.addf %94, %96 : vector<8x128xf32>
    %c0_105 = arith.constant 0 : index
    %c0_106 = arith.constant 0 : index
    %c2_107 = arith.constant 2 : index
    %c0_108 = arith.constant 0 : index
    %c0_109 = arith.constant 0 : index
    %98 = vector.load %arg7[%c0_105, %c0_106, %c2_107, %c0_108, %c0_109] : memref<1x1x3x8x128xf32, #tpu.memory_space<vmem>>, vector<1x1x1x8x128xf32>
    %99 = vector.shape_cast %98 : vector<1x1x1x8x128xf32> to vector<8x128xf32>
    %100 = vector.shape_cast %97 : vector<8x128xf32> to vector<1x1x1x8x128xf32>
    tpu.vector_store %arg7[%c0_105, %c0_106, %c2_107, %c0_108, %c0_109], %100 {strides = array<i32>} : memref<1x1x3x8x128xf32, #tpu.memory_space<vmem>>, vector<1x1x1x8x128xf32>,
    return
  }
  func.func @transform_0(%arg0: i32, %arg1: i32, %arg2: i32) -> (i32, i32, i32, i32) {
    %c1_i32 = arith.constant 1 : i32
    %0 = arith.muli %arg1, %c1_i32 : i32
    %1 = arith.addi %0, %arg2 : i32
    %c0_i32 = arith.constant 0 : i32
    %c0_i32_0 = arith.constant 0 : i32
    %c0_i32_1 = arith.constant 0 : i32
    return %arg0, %c0_i32, %1, %c0_i32_0 : i32, i32, i32, i32
  }
  func.func @transform_1(%arg0: i32, %arg1: i32, %arg2: i32) -> (i32, i32, i32) {
    %c1_i32 = arith.constant 1 : i32
    %0 = arith.muli %arg1, %c1_i32 : i32
    %1 = arith.addi %0, %arg2 : i32
    %c0_i32 = arith.constant 0 : i32
    %c0_i32_0 = arith.constant 0 : i32
    return %arg0, %1, %c0_i32 : i32, i32, i32
  }
  func.func @transform_2(%arg0: i32, %arg1: i32, %arg2: i32) -> (i32, i32, i32, i32, i32) {
    %c0_i32 = arith.constant 0 : i32
    %c0_i32_0 = arith.constant 0 : i32
    %c0_i32_1 = arith.constant 0 : i32
    %c0_i32_2 = arith.constant 0 : i32
    return %arg0, %arg1, %c0_i32, %c0_i32_0, %c0_i32_1 : i32, i32, i32, i32, i32
  }
  func.func @transform_3(%arg0: i32, %arg1: i32, %arg2: i32) -> (i32, i32, i32, i32, i32) {
    %c0_i32 = arith.constant 0 : i32
    %c0_i32_0 = arith.constant 0 : i32
    %c0_i32_1 = arith.constant 0 : i32
    %c0_i32_2 = arith.constant 0 : i32
    return %arg0, %arg1, %c0_i32, %c0_i32_0, %c0_i32_1 : i32, i32, i32, i32, i32
  }
  func.func @transform_4(%arg0: i32, %arg1: i32, %arg2: i32) -> (i32, i32, i32, i32, i32) {
    %c0_i32 = arith.constant 0 : i32
    %c0_i32_0 = arith.constant 0 : i32
    %c0_i32_1 = arith.constant 0 : i32
    %c0_i32_2 = arith.constant 0 : i32
    return %arg0, %arg1, %c0_i32, %c0_i32_0, %c0_i32_1 : i32, i32, i32, i32, i32
  }
}

</mosaic_0001>

<bundles_post_ra>
// kernel: square_dice_loss.1
= control target key start
LH: loop header
LB: loop body
LE: loop exit
PB: predicated region body
PF: predicated region fallthrough
CT: control target
= control target key end

     0   :  { %s766_s15 = smov 0   ;;  %s768_s16 = smov 0   ;;  %s818_s0 = inlined_call_operand.vmem [shape: f32[2,4,16,128], index: 0, kind: input, shape index: {}]   ;;  %s819_s1 = inlined_call_operand.vmem [shape: s32[2,16,128], index: 1, kind: input, shape index: {}]   ;;  %s820_s2 = inlined_call_operand.vmem [shape: f32[2,1,3,8,128], index: 2, kind: output, shape index: {0}]   ;;  %s821_s3 = inlined_call_operand.vmem [shape: f32[2,1,3,8,128], index: 3, kind: output, shape index: {1}]   ;;  %s822_s4 = inlined_call_operand.vmem [shape: f32[2,1,3,8,128], index: 4, kind: output, shape index: {2}]  }
   0x1   :  { %s770_s17 = smov 0  }
   0x2 LB: > { %s34_s18 = sadd.s32 1, %s734_s16  ;;  %p654_p0 = scmp.ge.s32.totalorder %s738_s17, 1  ;;  %s738_s17 = sphi %s770_s17, %s15_s17   ;;  %s734_s16 = sphi %s768_s16, %s824_s16   ;;  %s730_s15 = sphi %s766_s15, %s823_s15  }
   0x3   : > { %p36_p1 = scmp.ge.s32.totalorder %s34_s18, 2  ;;  %p224_p2 = scmp.lt.s32.totalorder %s738_s17, 3 }
   0x5   : > { %s826_s18 = smov (%p36_p1, %s34_s18), 0  ;;  %p225_p3 = pnand %p654_p0, %p224_p2 }
   0x6   : > { %p289_p4 = scmp.lt.s32.totalorder (!%p225_p3), %s730_s15, 1 }
   0x7   : > { %228 = sbr.rel (%p225_p3) target bundleno = 29 (0x1d), region = 28 }
   0xc   : > { %s828_s15 = smov (!%p289_p4, %s730_s15), 1  ;;  %v740_v15 = vmov 0.0  }
   0xd   : > { %s688_s19 = sshll.u32 %s828_s15, 6  ;;  %s689_s23 = sshll.u32 %s828_s15, 4 }
   0xe   : > { %s296_s22 = scalar_lea.vmem %s818_s0, %s688_s19  ;;  %s787_s24 = smul.u32 24, %s828_s15 }
   0xf   : > { %v662_v0 = vld [vmem:[%s296_s22 + $0x10] sm:$0xff]  ;;  %v663_v1 = vld [vmem:[%s296_s22 + $0x18] sm:$0xff]  ;;  %v666_v2 = vld [vmem:[%s296_s22 + $0x20] sm:$0xff]  ;;  %s308_s27 = scalar_lea.vmem %s819_s1, %s689_s23 }
  0x10   : > { %v364_v3 = vmul.f32 %v662_v0, %v662_v0  ;;  %v365_v4 = vmul.f32 %v663_v1, %v663_v1  ;;  %v667_v5 = vld [vmem:[%s296_s22 + $0x28] sm:$0xff]  ;;  %v676_v6 = vld [vmem:[%s296_s22 + $0x30] sm:$0xff]  ;;  %v677_v7 = vld [vmem:[%s296_s22 + $0x38] sm:$0xff]  ;;  %v389_v10 = vmul.f32 %v666_v2, %v666_v2  ;;  %s796_s30 = scalar_lea.vmem %s821_s3, %s787_s24  ;;  %s337_s7 = scalar_lea.vmem %s822_s4, %s787_s24 }
  0x11   : > { %v351_v8 = vld [vmem:[%s308_s27] sm:$0xff]  ;;  %v352_v9 = vld [vmem:[%s308_s27 + $0x8] sm:$0xff]  ;;  %v390_v11 = vmul.f32 %v667_v5, %v667_v5  ;;  %v417_v12 = vmul.f32 %v676_v6, %v676_v6  ;;  %v418_v13 = vmul.f32 %v677_v7, %v677_v7  ;;  %s319_s10 = scalar_lea.vmem %s820_s2, %s787_s24 }
  0x12   : > { %vm356_vm0 = vcmp.eq.s32.totalorder %v351_v8, 1  ;;  %vm357_vm1 = vcmp.eq.s32.totalorder %v352_v9, 1  ;;  %v371_v14 = vadd.f32 %v365_v4, %v364_v3  ;;  %vm381_vm2 = vcmp.eq.s32.totalorder %v351_v8, 2 }
  0x13   : > { %v664_v16 = vsel %vm356_vm0, 1.0, %v740_v15  ;;  %v665_v17 = vsel %vm357_vm1, 1.0, %v740_v15  ;;  %vm382_vm3 = vcmp.eq.s32.totalorder %v352_v9, 2  ;;  %v668_v18 = vsel %vm381_vm2, 1.0, %v740_v15 }
  0x14   : > { %v362_v19 = vmul.f32 %v664_v16, %v662_v0  ;;  %v363_v20 = vmul.f32 %v665_v17, %v663_v1  ;;  %v375_v21 = vadd.f32 %v665_v17, %v664_v16  ;;  %v669_v22 = vsel %vm382_vm3, 1.0, %v740_v15  ;;  %373 = vst [vmem:[%s796_s30] sm:$0xff] %v371_v14 }
  0x15   : > { %v387_v23 = vmul.f32 %v668_v18, %v666_v2  ;;  %v398_v24 = vadd.f32 %v390_v11, %v389_v10  ;;  %vm409_vm4 = vcmp.eq.s32.totalorder %v351_v8, 3  ;;  %v388_v26 = vmul.f32 %v669_v22, %v667_v5 }
  0x16   : > { %v367_v25 = vadd.f32 %v363_v20, %v362_v19  ;;  %v403_v27 = vadd.f32 %v669_v22, %v668_v18  ;;  %vm410_vm5 = vcmp.eq.s32.totalorder %v352_v9, 3  ;;  %v678_v28 = vsel %vm409_vm4, 1.0, %v740_v15  ;;  %377 = vst [vmem:[%s337_s7] sm:$0xff] %v375_v21 }
  0x17   : > { %v426_v29 = vadd.f32 %v418_v13, %v417_v12  ;;  %v393_v30 = vadd.f32 %v388_v26, %v387_v23  ;;  %v679_v31 = vsel %vm410_vm5, 1.0, %v740_v15  ;;  %673 = vst [vmem:[%s796_s30 + $0x8] sm:$0xff] %v398_v24  ;;  %v415_v32 = vmul.f32 %v678_v28, %v676_v6 }
  0x18   : > { %v416_v33 = vmul.f32 %v679_v31, %v677_v7  ;;  %v431_v34 = vadd.f32 %v679_v31, %v678_v28  ;;  %369 = vst [vmem:[%s319_s10] sm:$0xff] %v367_v25  ;;  %675 = vst [vmem:[%s337_s7 + $0x8] sm:$0xff] %v403_v27 }
  0x19   : > { %683 = vst [vmem:[%s796_s30 + $0x10] sm:$0xff] %v426_v29  ;;  %671 = vst [vmem:[%s319_s10 + $0x8] sm:$0xff] %v393_v30 }
  0x1a   : > { %v421_v35 = vadd.f32 %v416_v33, %v415_v32  ;;  %685 = vst [vmem:[%s337_s7 + $0x10] sm:$0xff] %v431_v34 }
  0x1c   : > { %681 = vst [vmem:[%s319_s10 + $0x10] sm:$0xff] %v421_v35 }
  0x1d PF: > { %s15_s17 = sadd.s32 1, %s738_s17   ;;  %s823_s15 = smov %s734_s16 }
  0x1e   : > { %p12_p5 = scmp.ge.s32.totalorder %s15_s17, 4   ;;  %s824_s16 = smov %s826_s18 }
  0x20   :  { %14 = sbr.rel (!%p12_p5) target bundleno = 2 (0x2), region = 98 }

</bundles_post_ra>
